<compile_context>
chip_gen: v7x
topology: tpu7x:2x2x1
jax: 0.10.0
libtpu: 0.0.40
codegen_flags: <defaults>
</compile_context>

<pallas_src>
import functools

import jax
import jax.numpy as jnp
from jax.experimental import pallas as pl
from jax.experimental.pallas import tpu as pltpu


_RED_N = 128  # lane width of the resident reduction matrix (cols 0 and 1 used)


def summed_probs_kernel(x_ref, w_ref, b_ref, red_ref, o_ref):
    # logits = x @ W + b   (f32 in/out on the MXU — it is idle at K=32 anyway)
    logits = jnp.dot(x_ref[...], w_ref[...],
                     preferred_element_type=jnp.float32,
                     precision=jax.lax.Precision.HIGHEST) + b_ref[...]

    # Numerically-stable softmax with both lane reductions pushed to the MXU.
    m = jnp.max(logits, axis=-1, keepdims=True)             # [tb, 1]   (XLU)
    e = jnp.exp(logits - m)                                  # [tb, C]   (EUP)
    # red[:, 0] = target mask, red[:, 1] = ones, rest zero  ->  one matmul
    # yields both the masked numerator and the full denominator.
    nd = jnp.dot(e, red_ref[...],
                 preferred_element_type=jnp.float32,
                 precision=jax.lax.Precision.HIGHEST)        # [tb, 128] (MXU)
    num = nd[:, 0:1]                                         # sum(e * mask)
    den = nd[:, 1:2]                                         # sum(e)

    # Per-row divide only ([tb, 1]); exact reciprocal keeps the 1e-5 target.
    o_ref[...] = num * pl.reciprocal(den, approx=False)


def _round_up(x, m):
    return (x + m - 1) // m * m


@functools.partial(jax.jit, static_argnames=("tile_b", "core_parallel"))
def summed_probabilities(x, w, b, target_mask, *, tile_b=1024, core_parallel=False):
    """sum(softmax(x @ w + b, axis=1)[:, target_ids], axis=1) via one Pallas kernel.

    `target_mask` is [C] / [1, C] with 1.0 at the (distinct) target class ids.
    """
    B, H = x.shape
    Hw, C = w.shape
    assert Hw == H

    b2 = b.reshape(1, C).astype(jnp.float32)
    # Resident reduction matrix [C, _RED_N]: col 0 = target mask, col 1 = ones.
    mask_col = target_mask.reshape(C, 1).astype(jnp.float32)
    red = jnp.concatenate(
        [mask_col,
         jnp.ones((C, 1), jnp.float32),
         jnp.zeros((C, _RED_N - 2), jnp.float32)], axis=1)

    # Batch tile: multiple of 8 sublanes, up to tile_b rows (default 1024 so the
    # per-grid-step overhead amortizes).  No padding of x: grid = cdiv, and the
    # out-of-range rows of the last partial block are masked on the output write.
    tb = _round_up(min(tile_b, B), 8)
    grid = (pl.cdiv(B, tb),)

    batch_sem = pltpu.CORE_PARALLEL if core_parallel else "parallel"

    out = pl.pallas_call(
        summed_probs_kernel,
        out_shape=jax.ShapeDtypeStruct((B, 1), jnp.float32),
        grid_spec=pltpu.PrefetchScalarGridSpec(
            num_scalar_prefetch=0,
            grid=grid,
            in_specs=[
                pl.BlockSpec((tb, H), lambda i: (i, 0)),      # x: batch-tiled
                pl.BlockSpec((H, C), lambda i: (0, 0)),       # W: VMEM-resident
                pl.BlockSpec((1, C), lambda i: (0, 0)),       # bias: resident
                pl.BlockSpec((C, _RED_N), lambda i: (0, 0)),  # [mask|ones]: resident
            ],
            out_specs=pl.BlockSpec((tb, 1), lambda i: (i, 0)),
        ),
        compiler_params=pltpu.CompilerParams(
            dimension_semantics=(batch_sem,),
            vmem_limit_bytes=32 * 1024 * 1024,   # safe on v5e/v6e/v7x
        ),
    )(x.astype(jnp.float32), w.astype(jnp.float32), b2, red)
    return out[:, 0]  # shape [B], matching torch.sum(..., dim=1)


def _reference(x, w, b, target_ids):
    # Plain-JAX f32 reference (same matmul precision as the kernel).
    logits = jnp.dot(x, w, preferred_element_type=jnp.float32,
                     precision=jax.lax.Precision.HIGHEST) + b
    return jnp.sum(jax.nn.softmax(logits, axis=1)[:, target_ids], axis=1)


if __name__ == "__main__":
    H, C = 32, 128                      # hidden features, num classes
    target_ids = jnp.array([1, 3, 7, 42], dtype=jnp.int32)  # distinct ids

    key = jax.random.PRNGKey(0)
    kx, kw, kb = jax.random.split(key, 3)
    # deterministic "pretrained" linear classifier parameters
    w = jax.random.normal(kw, (H, C), dtype=jnp.float32) * 0.1
    b = jax.random.normal(kb, (1, C), dtype=jnp.float32) * 0.1
    # mask[c] = 1.0 iff c is a target id
    target_mask = jnp.zeros((1, C), dtype=jnp.float32).at[0, target_ids].set(1.0)

    # Case 1: small batch, single grid step.
    B = 8
    x = jax.random.normal(kx, (B, H), dtype=jnp.float32)
    out = jax.block_until_ready(summed_probabilities(x, w, b, target_mask))
    ref = _reference(x, w, b, target_ids)
    assert out.shape == (B,)
    assert jnp.allclose(out, ref, atol=1e-5, rtol=1e-5)

    # Case 2: multi-step grid with a partial (masked) tail block, no padding.
    B2 = 20
    x2 = jax.random.normal(jax.random.PRNGKey(1), (B2, H), dtype=jnp.float32)
    out2 = jax.block_until_ready(
        summed_probabilities(x2, w, b, target_mask, tile_b=8))
    ref2 = _reference(x2, w, b, target_ids)
    assert out2.shape == (B2,)
    assert jnp.allclose(out2, ref2, atol=1e-5, rtol=1e-5)

    # Case 3: B not a multiple of 8 with the default (oversized) tile -> single
    # partial block, still no padding copy.
    out3 = jax.block_until_ready(summed_probabilities(x2, w, b, target_mask))
    assert out3.shape == (B2,)
    assert jnp.allclose(out3, ref2, atol=1e-5, rtol=1e-5)

    print("KERNEL_OK")
</pallas_src>

<mosaic_0001>
module attributes {stable_mosaic.version = 11 : i64} {
  func.func @summed_probs_kernel(%arg0: i32, %arg1: memref<8x32xf32, #tpu.memory_space<vmem>>, %arg2: memref<32x128xf32, #tpu.memory_space<vmem>>, %arg3: memref<1x128xf32, #tpu.memory_space<vmem>>, %arg4: memref<128x128xf32, #tpu.memory_space<vmem>>, %arg5: memref<8x1xf32, #tpu.memory_space<vmem>>) attributes {dimension_semantics = [#tpu.dimension_semantics<parallel>], iteration_bounds = array<i64: 1>, scalar_prefetch = 0 : i64, scratch_operands = 0 : i64, tpu.core_type = #tpu.core_type<tc>, window_params = [{transform_indices = @transform_0, window_bounds = array<i64: 8, 32>}, {pipeline_mode = #tpu.pipeline_mode<synchronous>, transform_indices = @transform_1, window_bounds = array<i64: 32, 128>}, {pipeline_mode = #tpu.pipeline_mode<synchronous>, transform_indices = @transform_2, window_bounds = array<i64: 1, 128>}, {pipeline_mode = #tpu.pipeline_mode<synchronous>, transform_indices = @transform_3, window_bounds = array<i64: 128, 128>}, {transform_indices = @transform_4, window_bounds = array<i64: 8, 1>}]} {
    %c0 = arith.constant 0 : index
    %c0_0 = arith.constant 0 : index
    %0 = vector.load %arg1[%c0, %c0_0] : memref<8x32xf32, #tpu.memory_space<vmem>>, vector<8x32xf32>
    %c0_1 = arith.constant 0 : index
    %c0_2 = arith.constant 0 : index
    %1 = vector.load %arg2[%c0_1, %c0_2] : memref<32x128xf32, #tpu.memory_space<vmem>>, vector<32x128xf32>
    %cst = arith.constant dense<0.000000e+00> : vector<8x128xf32>
    %2 = tpu.matmul %0, %1, %cst {dimension_numbers = #tpu.dot_dimension_numbers<[1], [0], [0], [1], [0, 0, 1, 1], [], []>, precision = #tpu.contract_precision<fp32>} : vector<8x32xf32>, vector<32x128xf32>, vector<8x128xf32> -> vector<8x128xf32>
    %c0_3 = arith.constant 0 : index
    %c0_4 = arith.constant 0 : index
    %3 = vector.load %arg3[%c0_3, %c0_4] : memref<1x128xf32, #tpu.memory_space<vmem>>, vector<1x128xf32>
    %4 = vector.broadcast %3 : vector<1x128xf32> to vector<8x128xf32>
    %5 = arith.addf %2, %4 : vector<8x128xf32>
    %cst_5 = arith.constant dense<0xFF800000> : vector<8xf32>
    %6 = vector.multi_reduction <maximumf>, %5, %cst_5 [1] : vector<8x128xf32> to vector<8xf32>
    %7 = vector.shape_cast %6 : vector<8xf32> to vector<8x1xf32>
    %8 = vector.broadcast %7 : vector<8x1xf32> to vector<8x128xf32>
    %9 = arith.subf %5, %8 : vector<8x128xf32>
    %10 = math.exp %9 : vector<8x128xf32>
    %c0_6 = arith.constant 0 : index
    %c0_7 = arith.constant 0 : index
    %11 = vector.load %arg4[%c0_6, %c0_7] : memref<128x128xf32, #tpu.memory_space<vmem>>, vector<128x128xf32>
    %cst_8 = arith.constant dense<0.000000e+00> : vector<8x128xf32>
    %12 = tpu.matmul %10, %11, %cst_8 {dimension_numbers = #tpu.dot_dimension_numbers<[1], [0], [0], [1], [0, 0, 1, 1], [], []>, precision = #tpu.contract_precision<fp32>} : vector<8x128xf32>, vector<128x128xf32>, vector<8x128xf32> -> vector<8x128xf32>
    %13 = vector.extract_strided_slice %12 {offsets = [0, 0], sizes = [8, 1], strides = [1, 1]} : vector<8x128xf32> to vector<8x1xf32>
    %14 = vector.extract_strided_slice %12 {offsets = [0, 1], sizes = [8, 1], strides = [1, 1]} : vector<8x128xf32> to vector<8x1xf32>
    %15 = tpu.reciprocal %14 : vector<8x1xf32> -> vector<8x1xf32>
    %16 = arith.mulf %13, %15 : vector<8x1xf32>
    %c0_9 = arith.constant 0 : index
    %c0_10 = arith.constant 0 : index
    %17 = vector.load %arg5[%c0_9, %c0_10] : memref<8x1xf32, #tpu.memory_space<vmem>>, vector<8x1xf32>
    tpu.vector_store %arg5[%c0_9, %c0_10], %16 {strides = array<i32>} : memref<8x1xf32, #tpu.memory_space<vmem>>, vector<8x1xf32>,
    return
  }
  func.func @transform_0(%arg0: i32) -> (i32, i32) {
    %c0_i32 = arith.constant 0 : i32
    %c0_i32_0 = arith.constant 0 : i32
    return %arg0, %c0_i32 : i32, i32
  }
  func.func @transform_1(%arg0: i32) -> (i32, i32) {
    %c0_i32 = arith.constant 0 : i32
    %c0_i32_0 = arith.constant 0 : i32
    %c0_i32_1 = arith.constant 0 : i32
    return %c0_i32, %c0_i32_0 : i32, i32
  }
  func.func @transform_2(%arg0: i32) -> (i32, i32) {
    %c0_i32 = arith.constant 0 : i32
    %c0_i32_0 = arith.constant 0 : i32
    %c0_i32_1 = arith.constant 0 : i32
    return %c0_i32, %c0_i32_0 : i32, i32
  }
  func.func @transform_3(%arg0: i32) -> (i32, i32) {
    %c0_i32 = arith.constant 0 : i32
    %c0_i32_0 = arith.constant 0 : i32
    %c0_i32_1 = arith.constant 0 : i32
    return %c0_i32, %c0_i32_0 : i32, i32
  }
  func.func @transform_4(%arg0: i32) -> (i32, i32) {
    %c0_i32 = arith.constant 0 : i32
    %c0_i32_0 = arith.constant 0 : i32
    return %arg0, %c0_i32 : i32, i32
  }
}

</mosaic_0001>

<bundles_post_ra>
// kernel: summed_probabilities.1
= control target key start
LH: loop header
LB: loop body
LE: loop exit
PB: predicated region body
PF: predicated region fallthrough
CT: control target
= control target key end

     0   :  { %vm29_vm0 = vcmask 261120   ;;  %v1809_v0 = vmov 0.0|0.0   ;;  %vm1810_vm1 = vmmov 0   ;;  %v1811_v4 = vmov 0.0   ;;  %s2146_s1 = inlined_call_operand.vmem [shape: f32[32,128], index: 1, kind: input, shape index: {}]   ;;  %s2147_s0 = inlined_call_operand.vmem [shape: f32[8,32], index: 0, kind: input, shape index: {}]   ;;  %s2148_s3 = inlined_call_operand.vmem [shape: f32[128,128], index: 3, kind: input, shape index: {}]   ;;  %s2149_s2 = inlined_call_operand.vmem [shape: f32[1,128], index: 2, kind: input, shape index: {}]   ;;  %s2150_s4 = inlined_call_operand.vmem [shape: f32[8,1], index: 4, kind: output, shape index: {}]  }
   0x1   :  { %1601 = vmatprep.subr.bf16.mxu0 %v1809_v0  ;;  %v18_v1 = vld [vmem:[%s2146_s1] sm:$0xff]  ;;  %v19_v2 = vld [vmem:[%s2146_s1 + $0x8] sm:$0xff]  ;;  %v20_v3 = vld [vmem:[%s2146_s1 + $0x10] sm:$0xff]  ;;  %1333 = vmatprep.mubr.msk.f32.mxu0 %vm1810_vm1, %v1811_v4  ;;  %vm1186_vm2 = vcmask 7168  }
   0x2   :  { %v34_v5 = vand.u32 4294901760, %v18_v1  ;;  %v37_v6 = vand.u32 4294901760, %v19_v2  ;;  %v21_v7 = vld [vmem:[%s2146_s1 + $0x18] sm:$0xff]  ;;  %v40_v8 = vand.u32 4294901760, %v20_v3  ;;  %v17_v9 = vld [vmem:[%s2147_s0] sm:$0xff]  ;;  %1685 = vmatprep.subr.bf16.mxu1 %v1809_v0  ;;  %1493 = vmatprep.mubr.msk.f32.mxu1 %vm1810_vm1, %v1811_v4  ;;  %v524_v42 = vld [vmem:[%s2148_s3 + $0x8] sm:$0xff] }
   0x3   :  { %v43_v10 = vand.u32 4294901760, %v21_v7  ;;  %v31_v11 = vsel %vm29_vm0, %v17_v9, 0  ;;  %v523_v41 = vld [vmem:[%s2148_s3] sm:$0xff]  ;;  %v525_v43 = vld [vmem:[%s2148_s3 + $0x10] sm:$0xff]  ;;  %v543_v45 = vand.u32 4294901760, %v524_v42  ;;  %v526_v46 = vld [vmem:[%s2148_s3 + $0x18] sm:$0xff] }
   0x4   :  { %v1602_v12 = vpack.c.bf16 %v37_v6, %v34_v5  ;;  %v114_v13 = vsub.f32 %v18_v1, %v34_v5  ;;  %v121_v14 = vsub.f32 %v19_v2, %v37_v6  ;;  %v128_v15 = vsub.f32 %v20_v3, %v40_v8  ;;  %v527_v48 = vld [vmem:[%s2148_s3 + $0x20] sm:$0xff]  ;;  %v528_v49 = vld [vmem:[%s2148_s3 + $0x28] sm:$0xff]  ;;  %v529_v58 = vld [vmem:[%s2148_s3 + $0x30] sm:$0xff] }
   0x5   :  { %v135_v16 = vsub.f32 %v21_v7, %v43_v10  ;;  %v102_v17 = vand.u32 4294901760, %v31_v11  ;;  %v1605_v18 = vpack.c.bf16 %v43_v10, %v40_v8  ;;  %v540_v44 = vand.u32 4294901760, %v523_v41  ;;  %v530_v59 = vld [vmem:[%s2148_s3 + $0x38] sm:$0xff]  ;;  %v1192_v9 = vld [vmem:[%s2149_s2] ss:$0 sm:$0xff] }
   0x6   :  { %1603 = vmatpush3.bf16.msra.mxu0 %v1602_v12  ;;  %v115_v19 = vand.u32 4294901760, %v114_v13  ;;  %v122_v20 = vand.u32 4294901760, %v121_v14  ;;  %v129_v21 = vand.u32 4294901760, %v128_v15  ;;  %v1614_v37 = vpack.c.bf16 %v121_v14, %v114_v13 }
   0x7   :  { %1604 = vmatprep.subr.bf16.mxu0 %v1809_v0  ;;  %v103_v22 = vsub.f32 %v31_v11, %v102_v17  ;;  %v136_v23 = vand.u32 4294901760, %v135_v16  ;;  %v1617_v38 = vpack.c.bf16 %v135_v16, %v128_v15  ;;  %v546_v47 = vand.u32 4294901760, %v525_v43 }
   0x8   :  { %v116_v24 = vsub.f32 %v114_v13, %v115_v19  ;;  %v123_v25 = vsub.f32 %v121_v14, %v122_v20  ;;  %v130_v26 = vsub.f32 %v128_v15, %v129_v21  ;;  %v1626_v39 = vpack.c.bf16 %v122_v20, %v115_v19  ;;  %v531_v13 = vld [vmem:[%s2148_s3 + $0x40] sm:$0xff]  ;;  %v532_v14 = vld [vmem:[%s2148_s3 + $0x48] sm:$0xff]  ;;  %v533_v20 = vld [vmem:[%s2148_s3 + $0x50] sm:$0xff] }
   0x9   :  { %v104_v27 = vand.u32 4294901760, %v103_v22  ;;  %v137_v28 = vsub.f32 %v135_v16, %v136_v23  ;;  %v1629_v40 = vpack.c.bf16 %v136_v23, %v129_v21  ;;  %v549_v50 = vand.u32 4294901760, %v526_v46  ;;  %v534_v21 = vld [vmem:[%s2148_s3 + $0x58] sm:$0xff] }
   0xa   :  { %1606 = vmatpush3.bf16.msra.mxu0 %v1605_v18  ;;  %v117_v29 = vand.u32 4294901760, %v116_v24  ;;  %v124_v30 = vand.u32 4294901760, %v123_v25  ;;  %v131_v33 = vand.u32 4294901760, %v130_v26  ;;  %v552_v51 = vand.u32 4294901760, %v527_v48 }
   0xb   :  { %v105_v31 = vsub.f32 %v103_v22, %v104_v27  ;;  %1607 = vmatprep.subr.bf16.mxu0 %v1809_v0  ;;  %v138_v34 = vand.u32 4294901760, %v137_v28  ;;  %v555_v52 = vand.u32 4294901760, %v528_v49  ;;  %v1902_v53 = vsub.f32 %v523_v41, %v540_v44 }
   0xc   :  { %v1608_v32 = vpack.c.bf16 %v124_v30, %v117_v29  ;;  %v1904_v54 = vsub.f32 %v524_v42, %v543_v45  ;;  %v1906_v55 = vsub.f32 %v525_v43, %v546_v47  ;;  %v1908_v56 = vpack.c.bf16 %v543_v45, %v540_v44  ;;  %v535_v29 = vld [vmem:[%s2148_s3 + $0x60] sm:$0xff]  ;;  %v536_v30 = vld [vmem:[%s2148_s3 + $0x68] sm:$0xff] }
   0xd   :  { %v106_v35 = vand.u32 4294901760, %v105_v31  ;;  %v1611_v36 = vpack.c.bf16 %v138_v34, %v131_v33  ;;  %v1910_v57 = vsub.f32 %v526_v46, %v549_v50  ;;  %v1921_v61 = vpack.c.bf16 %v549_v50, %v546_v47  ;;  %v537_v31 = vld [vmem:[%s2148_s3 + $0x70] sm:$0xff] }
   0xe   :  { %v1686_v60 = vpack.c.bf16 %v1904_v54, %v1902_v53  ;;  %v1923_v62 = vsub.f32 %v527_v48, %v552_v51  ;;  %v1928_v1 = vsub.f32 %v528_v49, %v555_v52  ;;  %v558_v2 = vand.u32 4294901760, %v529_v58 }
   0xf   :  { %1334 = vmatmul.mubr.f32.vlgmr.msra.gmra.mrb[0].mxu0 %v106_v35  ;;  %v1689_v63 = vpack.c.bf16 %v1910_v57, %v1906_v55  ;;  %v561_v3 = vand.u32 4294901760, %v530_v59  ;;  %v564_v15 = vand.u32 4294901760, %v531_v13  ;;  %v567_v16 = vand.u32 4294901760, %v532_v14  ;;  %v538_v35 = vld [vmem:[%s2148_s3 + $0x78] sm:$0xff]  ;;  %s1812_s3 = smov 127  }
  0x10   :  { %1609 = vmatpush3.bf16.msra.mxu0 %v1608_v32  ;;  %1344 = vmatprep.mubr.msk.f32.mxu0 %vm1810_vm1, %v1811_v4  ;;  %v1692_v5 = vpack.c.bf16 %v1928_v1, %v1923_v62  ;;  %v1935_v6 = vsub.f32 %v529_v58, %v558_v2  ;;  %v570_v23 = vand.u32 4294901760, %v533_v20  ;;  %v573_v24 = vand.u32 4294901760, %v534_v21 }
  0x11   :  { %1610 = vmatprep.subr.bf16.mxu0 %v1809_v0  ;;  %1687 = vmatpush3.bf16.msra.mxu1 %v1686_v60  ;;  %v1937_v7 = vsub.f32 %v530_v59, %v561_v3  ;;  %v1960_v19 = vsub.f32 %v532_v14, %v567_v16  ;;  %v1972_v25 = vpack.c.bf16 %v561_v3, %v558_v2  ;;  %v576_v33 = vand.u32 4294901760, %v535_v29 }
  0x12   :  { %1688 = vmatprep.subr.bf16.mxu1 %v1809_v0  ;;  %v1974_v26 = vsub.f32 %v533_v20, %v570_v23  ;;  %v1979_v28 = vpack.c.bf16 %v567_v16, %v564_v15  ;;  %v579_v34 = vand.u32 4294901760, %v536_v30  ;;  %v1999_v43 = vpack.c.bf16 %v573_v24, %v570_v23 }
  0x13   :  { %v1695_v8 = vpack.c.bf16 %v1937_v7, %v1935_v6  ;;  %v696_v48 = vand.u32 4294901760, %v1960_v19 }
  0x14   :  { %1612 = vmatpush3.bf16.msra.mxu0 %v1611_v36  ;;  %v582_v36 = vand.u32 4294901760, %v537_v31  ;;  %v2004_v45 = vpack.c.bf16 %v579_v34, %v576_v33  ;;  %v703_v58 = vand.u32 4294901760, %v1974_v26 }
  0x15   :  { %1613 = vmatprep.subr.bf16.mxu0 %v1809_v0  ;;  %1690 = vmatpush3.bf16.msra.mxu1 %v1689_v63  ;;  %v697_v50 = vsub.f32 %v1960_v19, %v696_v48 }
  0x16   :  { %1691 = vmatprep.subr.bf16.mxu1 %v1809_v0  ;;  %v704_v63 = vsub.f32 %v1974_v26, %v703_v58 }
  0x17   :  { %1345 = vmatmul.mubr.f32.vlgmr.msra.gmra.mrb[0].mxu0 %v102_v17 }
  0x18   :  { %1615 = vmatpush3.bf16.msra.mxu0 %v1614_v37  ;;  %1355 = vmatprep.mubr.msk.f32.mxu0 %vm1810_vm1, %v1811_v4  ;;  %v585_v37 = vand.u32 4294901760, %v538_v35  ;;  %v705_v3 = vand.u32 4294901760, %v704_v63 }
  0x19   :  { %1616 = vmatprep.subr.bf16.mxu0 %v1809_v0  ;;  %1693 = vmatpush3.bf16.msra.mxu1 %v1692_v5 }
  0x1a   :  { %1694 = vmatprep.subr.bf16.mxu1 %v1809_v0  ;;  %v737_v41 = vsub.f32 %v538_v35, %v585_v37  ;;  %v2010_v46 = vpack.c.bf16 %v585_v37, %v582_v36  ;;  %v640_v35 = vand.u32 4294901760, %v1904_v54 }
  0x1c   :  { %1618 = vmatpush3.bf16.msra.mxu0 %v1617_v38  ;;  %v716_v38 = vsub.f32 %v535_v29, %v576_v33  ;;  %v641_v37 = vsub.f32 %v1904_v54, %v640_v35 }
  0x1d   :  { %1619 = vmatprep.subr.bf16.mxu0 %v1809_v0  ;;  %1696 = vmatpush3.bf16.msra.mxu1 %v1695_v8 }
  0x1e   :  { %1697 = vmatprep.subr.bf16.mxu1 %v1809_v0  ;;  %v717_v8 = vand.u32 4294901760, %v716_v38 }
  0x1f   :  { %1356 = vmatmul.mubr.f32.vlgmr.msra.gmra.mrb[0].mxu0 %v103_v22 }
  0x20   :  { %1621 = vmatpush3.bf16.msra.mxu0 %v1602_v12  ;;  %1366 = vmatprep.mubr.msk.f32.mxu0 %vm1810_vm1, %v1811_v4 }
  0x21   :  { %1622 = vmatprep.subr.bf16.mxu0 %v1809_v0 }
  0x24   :  { %1624 = vmatpush3.bf16.msra.mxu0 %v1605_v18 }
  0x25   :  { %1625 = vmatprep.subr.bf16.mxu0 %v1809_v0 }
  0x27   :  { %1367 = vmatmul.mubr.f32.vlgmr.msra.gmra.mrb[0].mxu0 %v104_v27  ;;  %v1976_v27 = vsub.f32 %v534_v21, %v573_v24 }
  0x28   :  { %1627 = vmatpush3.bf16.msra.mxu0 %v1626_v39  ;;  %1377 = vmatprep.mubr.msk.f32.mxu0 %vm1810_vm1, %v1811_v4  ;;  %v723_v39 = vsub.f32 %v536_v30, %v579_v34  ;;  %v633_v34 = vand.u32 4294901760, %v1902_v53 }
  0x29   :  { %1628 = vmatprep.subr.bf16.mxu0 %v1809_v0  ;;  %v1701_v32 = vpack.c.bf16 %v1976_v27, %v1974_v26  ;;  %v710_v59 = vand.u32 4294901760, %v1976_v27 }
  0x2a   :  { %v1704_v42 = vpack.c.bf16 %v723_v39, %v716_v38 }
  0x2b   :  { %v711_v2 = vsub.f32 %v1976_v27, %v710_v59  ;;  %v2032_v27 = vpack.c.bf16 %v710_v59, %v703_v58 }
  0x2c   :  { %1630 = vmatpush3.bf16.msra.mxu0 %v1629_v40  ;;  %v730_v40 = vsub.f32 %v537_v31, %v582_v36  ;;  %v634_v36 = vsub.f32 %v1902_v53, %v633_v34 }
  0x2d   :  { %1631 = vmatprep.subr.bf16.mxu0 %v1809_v0  ;;  %v712_v5 = vand.u32 4294901760, %v711_v2 }
  0x2e   :  { %v1707_v44 = vpack.c.bf16 %v737_v41, %v730_v40  ;;  %v731_v16 = vand.u32 4294901760, %v730_v40 }
  0x2f   :  { %1378 = vmatmul.mubr.f32.vlgmr.msra.gmra.mrb[0].mxu0 %v102_v17 }
  0x30   :  { %1633 = vmatpush3.bf16.msra.mxu0 %v1602_v12  ;;  %1388 = vmatprep.mubr.msk.f32.mxu0 %vm1810_vm1, %v1811_v4  ;;  %v732_v20 = vsub.f32 %v730_v40, %v731_v16 }
  0x31   :  { %1634 = vmatprep.subr.bf16.mxu0 %v1809_v0 }
  0x34   :  { %1636 = vmatpush3.bf16.msra.mxu0 %v1605_v18  ;;  %v1958_v18 = vsub.f32 %v531_v13, %v564_v15 }
  0x35   :  { %1637 = vmatprep.subr.bf16.mxu0 %v1809_v0 }
  0x36   :  { %v1698_v22 = vpack.c.bf16 %v1960_v19, %v1958_v18  ;;  %v689_v47 = vand.u32 4294901760, %v1958_v18 }
  0x37   :  { %1389 = vmatmul.mubr.f32.vlgmr.msra.gmra.mrb[0].mxu0 %v102_v17  ;;  %v1956_v17 = vpack.c.bf16 %v555_v52, %v552_v51  ;;  %v698_v52 = vand.u32 4294901760, %v697_v50  ;;  %v668_v50 = vand.u32 4294901760, %v1928_v1 }
  0x38   :  { %1423 = vmatprep.mubr.msk.f32.mxu0 %vm1810_vm1, %v1811_v4  ;;  %1639 = vmatpush3.bf16.msra.mxu0 %v1908_v56  ;;  %v690_v49 = vsub.f32 %v1958_v18, %v689_v47  ;;  %v738_v18 = vand.u32 4294901760, %v737_v41  ;;  %v2030_v26 = vpack.c.bf16 %v696_v48, %v689_v47 }
  0x39   :  { %1640 = vmatprep.subr.bf16.mxu0 %v1809_v0  ;;  %1699 = vmatpush3.bf16.msra.mxu1 %v1698_v22  ;;  %v733_v22 = vand.u32 4294901760, %v732_v20 }
  0x3a   :  { %1700 = vmatprep.subr.bf16.mxu1 %v1809_v0  ;;  %v691_v51 = vand.u32 4294901760, %v690_v49  ;;  %v739_v21 = vsub.f32 %v737_v41, %v738_v18  ;;  %v2036_v30 = vpack.c.bf16 %v738_v18, %v731_v16  ;;  %v635_v41 = vand.u32 4294901760, %v634_v36 }
  0x3b   :  { %v661_v49 = vand.u32 4294901760, %v1923_v62 }
  0x3c   :  { %1642 = vmatpush3.bf16.msra.mxu0 %v1921_v61  ;;  %v2020_v60 = vpack.c.bf16 %v698_v52, %v691_v51  ;;  %v740_v23 = vand.u32 4294901760, %v739_v21 }
  0x3d   :  { %1643 = vmatprep.subr.bf16.mxu0 %v1809_v0  ;;  %1702 = vmatpush3.bf16.msra.mxu1 %v1701_v32  ;;  %v662_v2 = vsub.f32 %v1923_v62, %v661_v49  ;;  %v1740_v53 = vpack.c.bf16 %v668_v50, %v661_v49 }
  0x3e   :  { %1703 = vmatprep.subr.bf16.mxu1 %v1809_v0  ;;  %v2028_v24 = vpack.c.bf16 %v740_v23, %v733_v22 }
  0x40   :  { %1645 = vmatpush3.bf16.msra.mxu0 %v1956_v17 }
  0x41   :  { %1646 = vmatprep.subr.bf16.mxu0 %v1809_v0  ;;  %1705 = vmatpush3.bf16.msra.mxu1 %v1704_v42 }
  0x42   :  { %1706 = vmatprep.subr.bf16.mxu1 %v1809_v0 }
  0x44   :  { %1648 = vmatpush3.bf16.msra.mxu0 %v1972_v25 }
  0x45   :  { %1649 = vmatprep.subr.bf16.mxu0 %v1809_v0  ;;  %1708 = vmatpush3.bf16.msra.mxu1 %v1707_v44  ;;  %v642_v44 = vand.u32 4294901760, %v641_v37 }
  0x46   :  { %1709 = vmatprep.subr.bf16.mxu1 %v1809_v0 }
  0x47   :  { %v1662_v58 = vpack.c.bf16 %v642_v44, %v635_v41 }
  0x48   :  { %1651 = vmatpush3.bf16.msra.mxu0 %v1979_v28 }
  0x49   :  { %1652 = vmatprep.subr.bf16.mxu0 %v1809_v0 }
  0x4c   :  { %1654 = vmatpush3.bf16.msra.mxu0 %v1999_v43 }
  0x4d   :  { %1655 = vmatprep.subr.bf16.mxu0 %v1809_v0 }
  0x50   :  { %1657 = vmatpush3.bf16.msra.mxu0 %v2004_v45 }
  0x51   :  { %1658 = vmatprep.subr.bf16.mxu0 %v1809_v0 }
  0x54   :  { %1660 = vmatpush3.bf16.msra.mxu0 %v2010_v46 }
  0x55   :  { %1661 = vmatprep.subr.bf16.mxu0 %v1809_v0 }
 0x10a   :  { %v514_v10 = vpop.f32.mrb[0].mxu0 }
 0x10b   :  { %v1947_v11 = vadd.f32 %v1192_v9, %v514_v10  ;;  %v1390_v12 = vpop.f32.mrb[1].mxu0  ;;  %v724_v9 = vand.u32 4294901760, %v723_v39  ;;  %v2024_v10 = vpack.c.bf16 %v712_v5, %v705_v3  ;;  %v669_v3 = vsub.f32 %v1928_v1, %v668_v50 }
 0x10c   :  { %v718_v12 = vsub.f32 %v716_v38, %v717_v8  ;;  %v647_v38 = vand.u32 4294901760, %v1906_v55  ;;  %v675_v5 = vand.u32 4294901760, %v1935_v6 }
 0x10d   :  { %518 = vmax.xlane.f32.xlu0 %v1947_v11  ;;  %v725_v13 = vsub.f32 %v723_v39, %v724_v9  ;;  %v2034_v29 = vpack.c.bf16 %v724_v9, %v717_v8  ;;  %v654_v39 = vand.u32 4294901760, %v1910_v57  ;;  %v682_v8 = vand.u32 4294901760, %v1937_v7 }
 0x10e   :  { %v719_v14 = vand.u32 4294901760, %v718_v12  ;;  %v648_v47 = vsub.f32 %v1906_v55, %v647_v38 }
 0x10f   :  { %v726_v15 = vand.u32 4294901760, %v725_v13  ;;  %v655_v48 = vsub.f32 %v1910_v57, %v654_v39  ;;  %v663_v13 = vand.u32 4294901760, %v662_v2  ;;  %v683_v16 = vsub.f32 %v1937_v7, %v682_v8 }
 0x110   :  { %v649_v59 = vand.u32 4294901760, %v648_v47  ;;  %v1734_v7 = vpack.c.bf16 %v640_v35, %v633_v34  ;;  %v1743_v54 = vpack.c.bf16 %v682_v8, %v675_v5 }
 0x111   :  { %v2026_v19 = vpack.c.bf16 %v726_v15, %v719_v14  ;;  %v656_v63 = vand.u32 4294901760, %v655_v48  ;;  %v670_v14 = vand.u32 4294901760, %v669_v3  ;;  %v676_v15 = vsub.f32 %v1935_v6, %v675_v5 }
 0x112   :  { %v684_v20 = vand.u32 4294901760, %v683_v16 }
 0x113   :  { %v1665_v12 = vpack.c.bf16 %v656_v63, %v649_v59  ;;  %v1668_v1 = vpack.c.bf16 %v670_v14, %v663_v13  ;;  %v677_v18 = vand.u32 4294901760, %v676_v15 }
 0x115   :  { %v1671_v6 = vpack.c.bf16 %v684_v20, %v677_v18 }
 0x19a   :  { %v519_v31 = vpop.xlane.xlu0 %518 }
 0x19b   :  { %v520_v32 = vsub.f32 %v1947_v11, %v519_v31 }
 0x19d   :  { %v521_v33 = vmul.f32 1.442695, %v520_v32 }
 0x19f   :  { %1805 = vpow2.f32 %v521_v33 }
 0x1a9   :  { %v1806_v40 = vpop.eup %1805 }
 0x1aa   :  { %v2049_v11 = vand.u32 4294901760, %v1806_v40 }
 0x1ac   :  { %v621_v42 = vsub.f32 %v1806_v40, %v2049_v11 }
 0x1ae   :  { %v622_v51 = vand.u32 4294901760, %v621_v42  ;;  %1494 = vmatmul.mubr.f32.vlgmr.msra.gmra.mrb[0].mxu1 %v621_v42 }
 0x1af   :  { %1711 = vmatpush3.bf16.msra.mxu1 %v1908_v56  ;;  %1528 = vmatprep.mubr.msk.f32.mxu1 %vm1810_vm1, %v1811_v4 }
 0x1b0   :  { %1712 = vmatprep.subr.bf16.mxu1 %v1809_v0  ;;  %v623_v52 = vsub.f32 %v621_v42, %v622_v51 }
 0x1b2   :  { %v624_v9 = vand.u32 4294901760, %v623_v52 }
 0x1b3   :  { %1714 = vmatpush3.bf16.msra.mxu1 %v1921_v61 }
 0x1b4   :  { %1424 = vmatmul.mubr.f32.vlgmr.msra.gmra.mrb[2].mxu0 %v624_v9  ;;  %1715 = vmatprep.subr.bf16.mxu1 %v1809_v0 }
 0x1b5   :  { %1663 = vmatpush3.bf16.msra.mxu0 %v1662_v58  ;;  %1458 = vmatprep.mubr.msk.f32.mxu0 %vm1810_vm1, %v1811_v4 }
 0x1b6   :  { %1664 = vmatprep.subr.bf16.mxu0 %v1809_v0 }
 0x1b7   :  { %1717 = vmatpush3.bf16.msra.mxu1 %v1956_v17 }
 0x1b8   :  { %1718 = vmatprep.subr.bf16.mxu1 %v1809_v0 }
 0x1b9   :  { %1666 = vmatpush3.bf16.msra.mxu0 %v1665_v12 }
 0x1ba   :  { %1667 = vmatprep.subr.bf16.mxu0 %v1809_v0 }
 0x1bb   :  { %1720 = vmatpush3.bf16.msra.mxu1 %v1972_v25 }
 0x1bc   :  { %1721 = vmatprep.subr.bf16.mxu1 %v1809_v0 }
 0x1bd   :  { %1669 = vmatpush3.bf16.msra.mxu0 %v1668_v1 }
 0x1be   :  { %1670 = vmatprep.subr.bf16.mxu0 %v1809_v0 }
 0x1bf   :  { %1723 = vmatpush3.bf16.msra.mxu1 %v1979_v28 }
 0x1c0   :  { %1724 = vmatprep.subr.bf16.mxu1 %v1809_v0 }
 0x1c1   :  { %1672 = vmatpush3.bf16.msra.mxu0 %v1671_v6 }
 0x1c2   :  { %1673 = vmatprep.subr.bf16.mxu0 %v1809_v0 }
 0x1c3   :  { %1726 = vmatpush3.bf16.msra.mxu1 %v1999_v43 }
 0x1c4   :  { %1727 = vmatprep.subr.bf16.mxu1 %v1809_v0 }
 0x1c5   :  { %1675 = vmatpush3.bf16.msra.mxu0 %v2020_v60  ;;  %v1737_v60 = vpack.c.bf16 %v654_v39, %v647_v38 }
 0x1c6   :  { %1676 = vmatprep.subr.bf16.mxu0 %v1809_v0 }
 0x1c7   :  { %1729 = vmatpush3.bf16.msra.mxu1 %v2004_v45 }
 0x1c8   :  { %1730 = vmatprep.subr.bf16.mxu1 %v1809_v0 }
 0x1c9   :  { %1678 = vmatpush3.bf16.msra.mxu0 %v2024_v10 }
 0x1ca   :  { %1679 = vmatprep.subr.bf16.mxu0 %v1809_v0 }
 0x1cb   :  { %1732 = vmatpush3.bf16.msra.mxu1 %v2010_v46 }
 0x1cc   :  { %1733 = vmatprep.subr.bf16.mxu1 %v1809_v0 }
 0x1cd   :  { %1681 = vmatpush3.bf16.msra.mxu0 %v2026_v19 }
 0x1ce   :  { %1529 = vmatmul.mubr.f32.vlgmr.msra.gmra.mrb[0].mxu1 %v622_v51  ;;  %1682 = vmatprep.subr.bf16.mxu0 %v1809_v0 }
 0x1cf   :  { %1735 = vmatpush3.bf16.msra.mxu1 %v1734_v7  ;;  %1563 = vmatprep.mubr.msk.f32.mxu1 %vm1810_vm1, %v1811_v4 }
 0x1d0   :  { %1736 = vmatprep.subr.bf16.mxu1 %v1809_v0 }
 0x1d1   :  { %1684 = vmatpush3.bf16.msra.mxu0 %v2028_v24 }
 0x1d3   :  { %1738 = vmatpush3.bf16.msra.mxu1 %v1737_v60 }
 0x1d4   :  { %1459 = vmatmul.mubr.f32.vlgmr.msra.gmra.mrb[2].mxu0 %v2049_v11  ;;  %1739 = vmatprep.subr.bf16.mxu1 %v1809_v0 }
 0x1d7   :  { %1741 = vmatpush3.bf16.msra.mxu1 %v1740_v53 }
 0x1d8   :  { %1742 = vmatprep.subr.bf16.mxu1 %v1809_v0 }
 0x1db   :  { %1744 = vmatpush3.bf16.msra.mxu1 %v1743_v54 }
 0x1dc   :  { %1745 = vmatprep.subr.bf16.mxu1 %v1809_v0 }
 0x1df   :  { %1747 = vmatpush3.bf16.msra.mxu1 %v2030_v26 }
 0x1e0   :  { %1748 = vmatprep.subr.bf16.mxu1 %v1809_v0 }
 0x1e3   :  { %1750 = vmatpush3.bf16.msra.mxu1 %v2032_v27 }
 0x1e4   :  { %1751 = vmatprep.subr.bf16.mxu1 %v1809_v0 }
 0x1e7   :  { %1753 = vmatpush3.bf16.msra.mxu1 %v2034_v29 }
 0x1e8   :  { %1754 = vmatprep.subr.bf16.mxu1 %v1809_v0 }
 0x1eb   :  { %1756 = vmatpush3.bf16.msra.mxu1 %v2036_v30 }
 0x1ec   :  { %1757 = vmatprep.subr.bf16.mxu1 %v1809_v0 }
 0x1ee   :  { %1564 = vmatmul.mubr.f32.vlgmr.msra.gmra.mrb[0].mxu1 %v2049_v11 }
 0x1ef   :  { %1759 = vmatpush3.bf16.msra.mxu1 %v1908_v56  ;;  %1598 = vmatprep.mubr.msk.f32.mxu1 %vm1810_vm1, %v1811_v4 }
 0x1f0   :  { %1760 = vmatprep.subr.bf16.mxu1 %v1809_v0 }
 0x1f3   :  { %1762 = vmatpush3.bf16.msra.mxu1 %v1921_v61 }
 0x1f4   :  { %1763 = vmatprep.subr.bf16.mxu1 %v1809_v0 }
 0x1f7   :  { %1765 = vmatpush3.bf16.msra.mxu1 %v1956_v17 }
 0x1f8   :  { %1766 = vmatprep.subr.bf16.mxu1 %v1809_v0 }
 0x1fb   :  { %1768 = vmatpush3.bf16.msra.mxu1 %v1972_v25 }
 0x1fc   :  { %1769 = vmatprep.subr.bf16.mxu1 %v1809_v0 }
 0x1ff   :  { %1771 = vmatpush3.bf16.msra.mxu1 %v1979_v28 }
 0x200   :  { %1772 = vmatprep.subr.bf16.mxu1 %v1809_v0 }
 0x203   :  { %1774 = vmatpush3.bf16.msra.mxu1 %v1999_v43 }
 0x204   :  { %1775 = vmatprep.subr.bf16.mxu1 %v1809_v0 }
 0x207   :  { %1777 = vmatpush3.bf16.msra.mxu1 %v2004_v45 }
 0x208   :  { %1778 = vmatprep.subr.bf16.mxu1 %v1809_v0 }
 0x20b   :  { %1780 = vmatpush3.bf16.msra.mxu1 %v2010_v46 }
 0x20e   :  { %1599 = vmatmul.mubr.f32.vlgmr.msra.gmra.mrb[0].mxu1 %v2049_v11 }
 0x2a7   :  { %v777_v4 = vpop.f32.mrb[2].mxu0 }
 0x2a8   :  { %v1460_v55 = vpop.f32.mrb[3].mxu0 }
 0x2e1   :  { %v1176_v56 = vpop.f32.mrb[0].mxu1 }
 0x2e2   :  { %v1782_v57 = vadd.f32 %v1176_v56, %v777_v4  ;;  %v1600_v61 = vpop.f32.mrb[1].mxu1 }
 0x2e4   :  { %1807 = vrcp.f32 %v1782_v57 }
 0x2ee   :  { %v1808_v62 = vpop.eup %1807 }
 0x2ef   :  { %1182 = vrot.lane.b32.xlu0 %v1808_v62, %s1812_s3 }
 0x361   :  { %v1183_v17 = vpop.permute.xlu0 %1182 }
 0x362   :  { %v1185_v25 = vmul.f32 %v1782_v57, %v1183_v17 }
 0x364   :  { %1187 = vst.msk [vmem:[%s2150_s4] sm:$0xff] %vm1186_vm2, %v1185_v25 }

</bundles_post_ra>
